<compile_context>
chip_gen: v6e
topology: v6e:2x2x1
jax: 0.10.0
libtpu: 0.0.40
codegen_flags: <defaults>
</compile_context>

<pallas_src>
import functools

import jax
import jax.numpy as jnp
from jax.experimental import pallas as pl
from jax.experimental.pallas import tpu as pltpu


def _repeat_kernel(x_ref, o_ref, *, r1_blk, r2):
    # Elementwise hot path on the VPU (free — the store is the binding unit),
    # then build the full lane-dense output block once and store it with a
    # single wide vst / DMA writeback.
    doubled = x_ref[...] + x_ref[...]
    tile = jnp.tile(doubled, (r1_blk, r2))
    o_ref[...] = tile.astype(o_ref.dtype)


def _largest_divisor_at_most(n: int, cap: int) -> int:
    """Largest divisor of n that is <= cap (always >= 1)."""
    best = 1
    for d in range(1, n + 1):
        if n % d == 0 and d <= cap:
            best = d
    return best


def repeat_module(
    x: jax.Array,
    repeats: tuple[int, int, int],
    *,
    max_block_bytes: int = 4 * 1024 * 1024,  # safe to double-buffer on v5e/v7x
) -> jax.Array:
    """Pallas implementation of RepeatModule((r0, r1, r2)) for a 2-D input x."""
    assert x.ndim == 2, "this kernel handles a 2-D input with a 3-element repeats"
    r0, r1, r2 = repeats
    R, C = x.shape
    out_shape = (r0, r1 * R, r2 * C)
    itemsize = jnp.dtype(x.dtype).itemsize

    # Fold as many r1-repeats as fit the VMEM budget into one output block.
    # One r1-repeat slab is (R, r2*C); the block is (r1_blk*R, r2*C).
    slab_bytes = R * r2 * C * itemsize
    cap = max(1, max_block_bytes // max(1, slab_bytes))
    r1_blk = _largest_divisor_at_most(r1, cap)
    n_r1_blocks = r1 // r1_blk

    blk_rows = r1_blk * R          # multiple of 8 (R is sublane-aligned)
    blk_cols = r2 * C              # full lane extent: large multiple of 128

    kernel = functools.partial(_repeat_kernel, r1_blk=r1_blk, r2=r2)

    out_bytes = r0 * r1 * R * r2 * C * itemsize
    in_bytes = R * C * itemsize
    cost = pl.CostEstimate(
        flops=r0 * r1 * R * r2 * C,   # the (x + x) per output element
        transcendentals=0,
        bytes_accessed=out_bytes + in_bytes,
    )

    return pl.pallas_call(
        kernel,
        out_shape=jax.ShapeDtypeStruct(out_shape, x.dtype),
        grid_spec=pltpu.PrefetchScalarGridSpec(
            num_scalar_prefetch=0,
            grid=(r0, n_r1_blocks),
            in_specs=[
                # Always read the full (R, C) input, regardless of grid point.
                pl.BlockSpec((R, C), lambda i, j: (0, 0)),
            ],
            # Squeezed leading dim -> kernel sees a 2-D (blk_rows, blk_cols) ref.
            out_specs=pl.BlockSpec(
                (pl.Squeezed(), blk_rows, blk_cols), lambda i, j: (i, j, 0)
            ),
        ),
        compiler_params=pltpu.CompilerParams(
            dimension_semantics=("parallel", "parallel")
        ),
        cost_estimate=cost,
    )(x)


if __name__ == "__main__":
    key = jax.random.PRNGKey(0)
    # Small, TPU-tile-aligned input: [8, 128]; repeats adds a new leading dim
    # (matching torch's repeat semantics when len(repeats) > tensor.ndim).
    R, C = 8, 128
    repeats = (2, 3, 2)
    x = jax.random.normal(key, (R, C), dtype=jnp.float32)

    out = repeat_module(x, repeats)
    out = jax.block_until_ready(out)

    # Reference: torch's (x + x).repeat(2, 3, 2) == np.tile(x + x, (2, 3, 2)).
    ref = jnp.tile(x + x, repeats)
    assert out.shape == ref.shape, (out.shape, ref.shape)
    assert jnp.allclose(out, ref), "mismatch vs reference"

    print("KERNEL_OK")
</pallas_src>

<mosaic_0001>
module attributes {stable_mosaic.version = 11 : i64} {
  func.func @_repeat_kernel(%arg0: i32, %arg1: i32, %arg2: memref<8x128xf32, #tpu.memory_space<vmem>>, %arg3: memref<1x24x256xf32, #tpu.memory_space<vmem>>) attributes {dimension_semantics = [#tpu.dimension_semantics<parallel>, #tpu.dimension_semantics<parallel>], iteration_bounds = array<i64: 2, 1>, scalar_prefetch = 0 : i64, scratch_operands = 0 : i64, tpu.core_type = #tpu.core_type<tc>, window_params = [{pipeline_mode = #tpu.pipeline_mode<synchronous>, transform_indices = @transform_0, window_bounds = array<i64: 8, 128>}, {transform_indices = @transform_1, window_bounds = array<i64: 1, 24, 256>}]} {
    %c0 = arith.constant 0 : index
    %c0_0 = arith.constant 0 : index
    %0 = vector.load %arg2[%c0, %c0_0] : memref<8x128xf32, #tpu.memory_space<vmem>>, vector<8x128xf32>
    %c0_1 = arith.constant 0 : index
    %c0_2 = arith.constant 0 : index
    %1 = vector.load %arg2[%c0_1, %c0_2] : memref<8x128xf32, #tpu.memory_space<vmem>>, vector<8x128xf32>
    %2 = arith.addf %0, %1 : vector<8x128xf32>
    %3 = tpu.concatenate %2, %2, %2 in 0 : vector<8x128xf32>, vector<8x128xf32>, vector<8x128xf32> -> vector<24x128xf32>
    %4 = tpu.concatenate %3, %3 in 1 : vector<24x128xf32>, vector<24x128xf32> -> vector<24x256xf32>
    %c0_3 = arith.constant 0 : index
    %c0_4 = arith.constant 0 : index
    %c0_5 = arith.constant 0 : index
    %5 = vector.load %arg3[%c0_3, %c0_4, %c0_5] : memref<1x24x256xf32, #tpu.memory_space<vmem>>, vector<1x24x256xf32>
    %6 = vector.shape_cast %5 : vector<1x24x256xf32> to vector<24x256xf32>
    %7 = vector.shape_cast %4 : vector<24x256xf32> to vector<1x24x256xf32>
    tpu.vector_store %arg3[%c0_3, %c0_4, %c0_5], %7 {strides = array<i32>} : memref<1x24x256xf32, #tpu.memory_space<vmem>>, vector<1x24x256xf32>,
    return
  }
  func.func @transform_0(%arg0: i32, %arg1: i32) -> (i32, i32) {
    %c0_i32 = arith.constant 0 : i32
    %c0_i32_0 = arith.constant 0 : i32
    %c0_i32_1 = arith.constant 0 : i32
    return %c0_i32, %c0_i32_0 : i32, i32
  }
  func.func @transform_1(%arg0: i32, %arg1: i32) -> (i32, i32, i32) {
    %c0_i32 = arith.constant 0 : i32
    %c0_i32_0 = arith.constant 0 : i32
    return %arg0, %arg1, %c0_i32 : i32, i32, i32
  }
}

</mosaic_0001>

<bundles_post_ra>
// kernel: tpu_custom_call.1
= control target key start
LH: loop header
LB: loop body
LE: loop exit
PB: predicated region body
PF: predicated region fallthrough
CT: control target
= control target key end

     0   :  { %6 = vsyncpa [#allocation3], 0  ;;  %s552_s0 = inlined_call_operand.hbm [shape: f32[8,128], index: 0, kind: input, shape index: {}]   ;;  %s553_s1 = inlined_call_operand.hbm [shape: f32[2,24,256], index: 1, kind: output, shape index: {}]  }
   0x1   :  { %7 = vsyncpa [#allocation4], 0 }
   0x2   :  { %9 = vsyncpa [#allocation4 + $0x1], 0  ;;  %s422_s6 = smov 0   ;;  %s424_s7 = smov 0  }
   0x3   :  { %s426_s8 = smov 0   ;;  %s428_s9 = smov 0  }
   0x4   :  { %s430_s10 = smov 0   ;;  %s432_s11 = smov 0  }
   0x5 LB: > { %s221_s12 = sadd.s32 4294967295, %s406_s11   ;;  %s222_s13 = sadd.s32 4294967294, %s406_s11   ;;  %s406_s11 = sphi %s432_s11, %s15_s11   ;;  %s402_s10 = sphi %s430_s10, %s562_s10   ;;  %s398_s9 = sphi %s428_s9, %s561_s9   ;;  %s394_s8 = sphi %s426_s8, %s560_s8   ;;  %s390_s7 = sphi %s424_s7, %s559_s7   ;;  %s386_s6 = sphi %s422_s6, %s558_s6  }
   0x6   : > { %s27_s14 = sadd.s32 1, %s402_s10  ;;  %s57_s15 = sadd.s32 1, %s394_s8 }
   0x7   : > { %p29_p0 = scmp.ge.s32.totalorder %s27_s14, 2  ;;  %p67_p1 = scmp.ne.s32.totalorder %s394_s8, %s390_s7 }
   0x8   : > { %p68_p2 = scmp.eq.s32.totalorder %s221_s12, 1  ;;  %p73_p3 = scmp.ne.s32.totalorder %s390_s7, %s386_s6 }
   0x9   : > { %s564_s14 = smov (%p29_p0, %s27_s14), 0  ;;  %p74_p5 = scmp.eq.s32.totalorder %s222_s13, 1 }
   0xa   : > { %p462_p4 = por %p68_p2, %p67_p1  ;;  %s52_s17 = ssub.s32 %s402_s10, %s564_s14 }
   0xb   : > { %p223_p6 = scmp.ge.s32.totalorder %s406_s11, 1  ;;  %p55_p7 = scmp.eq.s32.totalorder %s52_s17, 0 }
   0xc   : > { %p469_p8 = por %p74_p5, %p73_p3  ;;  %p81_p9 = scmp.lt.s32.totalorder %s406_s11, 3 }
   0xd   : > { %s475_s19 = scalar_select %p55_p7, %s394_s8, %s57_s15  }
   0xe   : > { %p477_p10 = pnand %p223_p6, %p81_p9  ;;  %p481_p11 = scmp.eq.s32.totalorder %s221_s12, 0 }
   0xf   : > { %s408_s22 = smov [#allocation2]  }
  0x10   : > { %p238_p12 = pneg %p477_p10  ;;  %s94_s23 = sshll.u32 %s408_s22, 4  ;;  %s95_s23 = int_to_ptr.vmem [resolvable:$true] %s94_s23 }
  0x11   : > { %s311_s24 = scalar_lea.vmem %s95_s23, 128  ;;  %p319_p5 = scmp.lt.s32.totalorder %s95_s23, %s95_s23 }
  0x12   : > { %p239_p13 = pnand %p481_p11, %p238_p12  ;;  %p312_p1 = scmp.ne.s32.totalorder %s95_s23, %s311_s24 }
  0x13   : > { %p320_p6 = scmp.lt.s32.totalorder %s311_s24, %s311_s24 }
  0x14   : > { %p302_p0 = pneg %p239_p13 }
  0x15   : > { %p321_p7 = por %p320_p6, %p319_p5 }
  0x16   : > { %p314_p2 = pnand %p312_p1, %p302_p0 }
  0x18   : > { %p315_p3 = pneg %p314_p2 }
  0x1a   : > { %p322_p9 = pnand %p321_p7, %p315_p3 }
  0x1c   : > { %325 = shalt.err (!%p322_p9)
}
  0x1d   : > { %241 = dma.hbm_to_vmem [thread:$0]  (!%p239_p13), %s552_s0, 128, %s95_s23, [#allocation3]  }
  0x1e   : > { %107 = sbr.rel (%p477_p10) target bundleno = 63 (0x3f), region = 24 }
  0x23   : > { %377 = dma.done.wait (%p481_p11), [#allocation3], 128  }
  0x24   : > { %379 = vsyncadd (%p481_p11), [#allocation3], 4294967168  ;;  %s119_s27 = sand.u32 1, %s390_s7   ;;  %s231_s29 = smul.u32 768, %s398_s9  ;;  %v123_v0 = vld [vmem:[#allocation2] sm:$0xff] }
  0x25   : > { %s230_s28 = smul.u32 48, %s119_s27  ;;  %v124_v1 = vadd.f32 %v123_v0, %v123_v0  ;;  %s507_s9 = scalar_lea.sflag [#allocation4], %s119_s27 }
  0x26   : > { %s503_s5 = scalar_lea.hbm %s553_s1, %s231_s29  ;;  %s409_s13 = smov [#allocation5]  }
  0x27   : > { %s121_s30 = scalar_lea.vmem [#allocation5], %s230_s28  ;;  %s330_s15 = sshll.u32 %s409_s13, 4  ;;  %s331_s15 = int_to_ptr.vmem [resolvable:$false] %s330_s15 }
  0x28   : > { %s148_s2 = sshll.u32 %s121_s30, 4  ;;  %125 = vst [vmem:[%s121_s30] sm:$0xff] %v124_v1  ;;  %126 = vst [vmem:[%s121_s30 + $0x8] sm:$0xff] %v124_v1  ;;  %s332_s17 = scalar_lea.vmem %s331_s15, 1536  ;;  %s505_s2 = int_to_ptr.vmem [resolvable:$true] %s148_s2 }
  0x29   : > { %127 = vst [vmem:[%s121_s30 + $0x10] sm:$0xff] %v124_v1  ;;  %128 = vst [vmem:[%s121_s30 + $0x18] sm:$0xff] %v124_v1  ;;  %s326_s12 = scalar_lea.vmem %s505_s2, 768  ;;  %p333_p13 = scmp.lt.s32.totalorder %s505_s2, %s331_s15 }
  0x2a   : > { %129 = vst [vmem:[%s121_s30 + $0x20] sm:$0xff] %v124_v1  ;;  %130 = vst [vmem:[%s121_s30 + $0x28] sm:$0xff] %v124_v1  ;;  %p327_p10 = scmp.ne.s32.totalorder %s505_s2, %s326_s12  ;;  %p334_p0 = scmp.lt.s32.totalorder %s332_s17, %s326_s12 }
  0x2c   : > { %p328_p11 = pnand %p327_p10, %p462_p4  ;;  %p335_p1 = por %p334_p0, %p333_p13 }
  0x2e   : > { %p329_p12 = pneg %p328_p11 }
  0x30   : > { %p336_p2 = pnand %p335_p1, %p329_p12 }
  0x32   : > { %339 = shalt.err (!%p336_p2)
}
  0x33   : > { %s340_s20 = scalar_lea.hbm %s503_s5, 768  ;;  %s344_s23 = scalar_lea.hbm %s553_s1, 1536 }
  0x34   : > { %p341_p3 = scmp.ne.s32.totalorder %s503_s5, %s340_s20  ;;  %p345_p7 = scmp.lt.s32.totalorder %s503_s5, %s553_s1 }
  0x35   : > { %p346_p9 = scmp.lt.s32.totalorder %s344_s23, %s340_s20 }
  0x36   : > { %p342_p5 = pnand %p341_p3, %p462_p4 }
  0x37   : > { %p347_p10 = por %p346_p9, %p345_p7 }
  0x38   : > { %p343_p6 = pneg %p342_p5 }
  0x3a   : > { %p348_p11 = pnand %p347_p10, %p343_p6 }
  0x3c   : > { %351 = shalt.err (!%p348_p11)
}
  0x3d   : > { %s410_s26 = smov 256   ;;  %s411_s27 = smov 16  }
  0x3e   : > { %236 = dma.vmem_to_hbm [thread:$0]  (%p462_p4), %s505_s2, 768, %s503_s5, %s507_s9, %s410_s26, %s410_s26, %s411_s27  }
  0x3f PF: > { %p248_p12 = scmp.ge.s32.totalorder %s406_s11, 2  ;;  %s163_s28 = sand.u32 1, %s386_s6  }
  0x40   : > { %s164_s29 = scalar_lea.sflag [#allocation4], %s163_s28 }
  0x41   : > { %p243_p13 = pnand %p248_p12, %p469_p8 }
  0x43   : > { %p244_p0 = pneg %p243_p13 }
  0x45   : > { %381 = dma.done.wait (%p244_p0), %s164_s29, 768  }
  0x46   : > { %383 = vsyncadd (%p244_p0), %s164_s29, 4294966528  ;;  %s15_s11 = sadd.s32 1, %s406_s11   ;;  %s558_s6 = smov %s390_s7 }
  0x47   : > { %p12_p1 = scmp.ge.s32.totalorder %s15_s11, 4   ;;  %s559_s7 = smov %s394_s8 }
  0x48   : > { %s560_s8 = smov %s475_s19  ;;  %s561_s9 = smov %s402_s10 }
  0x49   : > { %s562_s10 = smov %s564_s14  ;;  %14 = sbr.rel (!%p12_p1) target bundleno = 5 (0x5), region = 61 }
  0x4e   :  { %169 = vsyncpa [#allocation3], 1 }
  0x4f   :  { %171 = vsyncpa [#allocation3 + $0x1], 1 }
  0x50   :  { %172 = vsyncpa [#allocation4], 1 }
  0x51   :  { %174 = vsyncpa [#allocation4 + $0x1], 1 }

</bundles_post_ra>
